<compile_context>
chip_gen: v7x
topology: tpu7x:2x2x1
jax: 0.10.0
libtpu: 0.0.40
codegen_flags: <defaults>
</compile_context>

<pallas_src>
import functools
import math

import jax
import jax.numpy as jnp
from jax.experimental import pallas as pl
from jax.experimental.pallas import tpu as pltpu

_HIGHEST = jax.lax.Precision.HIGHEST


def _round_up(x, m):
    return (x + m - 1) // m * m


# ---------------------------------------------------------------------------
# Kernel 1: node-feature projection   h = x @ W ;  f = h @ [a1 | a2 | 0...]
# ---------------------------------------------------------------------------
def _proj_kernel(x_ref, w_ref, ac_ref, h_ref, f_ref):
    h = jnp.dot(x_ref[...], w_ref[...],
                preferred_element_type=jnp.float32, precision=_HIGHEST)
    h_ref[...] = h.astype(h_ref.dtype)
    # single fused matmul for both attention projections; ac is padded to 128
    # lanes so this store is lane-dense (only columns 0 and 1 are meaningful).
    f_ref[...] = jnp.dot(h, ac_ref[...],
                         preferred_element_type=jnp.float32, precision=_HIGHEST)


# ---------------------------------------------------------------------------
# Kernel 2: masked attention + online softmax + aggregation + ELU
#   grid = (row tiles ["parallel"], col tiles ["arbitrary", last])
#   counts_ref: SMEM (n_row_tiles, n_col_tiles) int32 edge counts (scalar
#   prefetch); all-zero adjacency tiles skip the exp/mask/MXU work entirely.
# ---------------------------------------------------------------------------
def _gat_attn_kernel(counts_ref, f1_ref, f2_ref, adj_ref, h_ref, out_ref,
                     m_sc, l_sc, acc_sc, *, alpha, tk, h_resident):
    i = pl.program_id(0)
    j = pl.program_id(1)

    @pl.when(j == 0)
    def _init():
        m_sc[...] = jnp.full(m_sc.shape, -jnp.inf, m_sc.dtype)
        l_sc[...] = jnp.zeros(l_sc.shape, l_sc.dtype)
        acc_sc[...] = jnp.zeros(acc_sc.shape, acc_sc.dtype)

    @pl.when(counts_ref[i, j] > 0)          # skip all-zero adjacency tiles
    def _update():
        # e[i, j] = leaky_relu(f1[i] + f2[j])
        e = f1_ref[...] + f2_ref[...]                     # (tm,1)+(1,tk)->(tm,tk)
        e = jnp.where(e > 0, e, alpha * e)                # LeakyReLU(alpha)
        s = jnp.where(adj_ref[...] > 0, e, jnp.float32(-9e15))

        # online softmax update
        m_prev = m_sc[...]
        m_new = jnp.maximum(m_prev, jnp.max(s, axis=1, keepdims=True))
        scale = jnp.exp(m_prev - m_new)
        p = jnp.exp(s - m_new)                            # (tm, tk)
        l_sc[...] = scale * l_sc[...] + jnp.sum(p, axis=1, keepdims=True)

        if h_resident:
            start = pl.multiple_of(j * tk, 128)
            h_blk = h_ref[pl.ds(start, tk), :]            # slice the resident h
        else:
            h_blk = h_ref[...]                            # streamed (tk, f_out) tile
        if h_blk.dtype == jnp.float32:
            pv = jnp.dot(p, h_blk, preferred_element_type=jnp.float32,
                         precision=_HIGHEST)
        else:  # bf16 operands, f32 accumulation (v6e / v7x fast path)
            pv = jnp.dot(p.astype(h_blk.dtype), h_blk,
                         preferred_element_type=jnp.float32)
        acc_sc[...] = scale * acc_sc[...] + pv
        m_sc[...] = m_new

    @pl.when(j == pl.num_programs(1) - 1)
    def _finalize():
        l = l_sc[...]
        # rows with no processed edges (only padding rows here) stay 0, not NaN.
        h_prime = jnp.where(l > 0, acc_sc[...] / l, 0.0)
        # ELU (concat=True branch of the PyTorch module)
        out_ref[...] = jnp.where(h_prime > 0, h_prime,
                                 jnp.expm1(h_prime)).astype(out_ref.dtype)


# ---------------------------------------------------------------------------
# Wrapper
# ---------------------------------------------------------------------------
def gat_forward(x, adj, W, a, *, alpha, block_m=256, block_k=2048,
                bf16_aggregation=False):
    """Eval-mode GAT forward.

    x: (N, F_in), adj: (N, N) (any dtype; only `adj > 0` is used),
    W: (F_in, F_out), a: (2*F_out, 1).
    """
    N, f_in = x.shape
    f_out = W.shape[1]

    # ---- tile sizes: lane dim multiples of 128; tm | tk | n_pad ------------
    tk = min(_round_up(block_k, 128), _round_up(N, 128))
    n_pad = _round_up(N, tk)
    tm_cap = min(_round_up(block_m, 8), tk)
    tm = 8
    for cand in (1024, 512, 256, 128, 64, 32, 16, 8):
        if cand <= tm_cap and n_pad % cand == 0:
            tm = cand
            break
    while n_pad // tm < 2 and tm > 8:   # >=2 row tiles -> both v7x TCs get work
        tm //= 2
    n_rt, n_ct = n_pad // tm, n_pad // tk

    # ---- pad + dtype prep --------------------------------------------------
    x_p = jnp.zeros((n_pad, f_in), jnp.float32).at[:N].set(x.astype(jnp.float32))
    adj_p = jnp.zeros((n_pad, n_pad), jnp.int8).at[:N, :N].set(
        (adj > 0).astype(jnp.int8))
    counts = adj_p.astype(jnp.int32).reshape(n_rt, tm, n_ct, tk).sum(
        axis=(1, 3), dtype=jnp.int32)
    W = W.astype(jnp.float32)
    a_pad = jnp.zeros((f_out, 128), jnp.float32)
    a_pad = a_pad.at[:, 0].set(a[:f_out, 0].astype(jnp.float32))
    a_pad = a_pad.at[:, 1].set(a[f_out:, 0].astype(jnp.float32))

    h_dtype = jnp.bfloat16 if bf16_aggregation else jnp.float32
    h_itemsize = 2 if bf16_aggregation else 4

    # ---- projection (hoisted out of attention): h = x@W, f = h@[a1|a2] -----
    h, f = pl.pallas_call(
        _proj_kernel,
        out_shape=(jax.ShapeDtypeStruct((n_pad, f_out), h_dtype),
                   jax.ShapeDtypeStruct((n_pad, 128), jnp.float32)),
        grid_spec=pltpu.PrefetchScalarGridSpec(
            num_scalar_prefetch=0,
            grid=(n_rt,),
            in_specs=[pl.BlockSpec((tm, f_in), lambda i: (i, 0)),
                      pl.BlockSpec((f_in, f_out), lambda i: (0, 0)),
                      pl.BlockSpec((f_out, 128), lambda i: (0, 0))],
            out_specs=[pl.BlockSpec((tm, f_out), lambda i: (i, 0)),
                       pl.BlockSpec((tm, 128), lambda i: (i, 0))],
        ),
        compiler_params=pltpu.CompilerParams(
            dimension_semantics=("parallel",)),
    )(x_p, W, a_pad)

    f1 = f[:, 0:1]                        # (n_pad, 1)  query-side term
    f2_row = f[:, 1].reshape(1, n_pad)    # (1, n_pad)  key-side term, transposed once

    # ---- keep h fully VMEM-resident in the attention kernel when it fits ---
    h_resident = 2 * n_pad * f_out * h_itemsize <= 16 * 1024 * 1024
    if h_resident:
        h_spec = pl.BlockSpec((n_pad, f_out), lambda i, j, cnt: (0, 0))
    else:
        h_spec = pl.BlockSpec((tk, f_out), lambda i, j, cnt: (j, 0))

    vmem_est = (2 * tm * tk                            # adj int8, double buffered
                + 2 * (tm + tk) * 4                    # f1 / f2 tiles
                + (2 * n_pad * f_out * h_itemsize if h_resident
                   else 2 * tk * f_out * h_itemsize)   # h
                + 2 * tm * f_out * 4                   # output tile
                + (2 * tm + tm * f_out) * 4            # scratch
                + 8 * tm * tk * 4)                     # (tm,tk) f32 temporaries headroom
    vmem_limit = int(min(max(vmem_est + (4 << 20), 32 << 20), 48 << 20))

    kernel = functools.partial(_gat_attn_kernel, alpha=float(alpha), tk=tk,
                               h_resident=h_resident)

    out = pl.pallas_call(
        kernel,
        out_shape=jax.ShapeDtypeStruct((n_pad, f_out), jnp.float32),
        grid_spec=pltpu.PrefetchScalarGridSpec(
            num_scalar_prefetch=1,                     # per-tile edge counts -> SMEM
            grid=(n_rt, n_ct),
            in_specs=[
                pl.BlockSpec((tm, 1), lambda i, j, cnt: (i, 0)),     # f1
                pl.BlockSpec((1, tk), lambda i, j, cnt: (0, j)),     # f2 row
                pl.BlockSpec((tm, tk), lambda i, j, cnt: (i, j)),    # adj tile (int8)
                h_spec,                                              # h (values)
            ],
            out_specs=pl.BlockSpec((tm, f_out), lambda i, j, cnt: (i, 0)),
            scratch_shapes=[pltpu.VMEM((tm, 1), jnp.float32),        # running max
                            pltpu.VMEM((tm, 1), jnp.float32),        # running sum
                            pltpu.VMEM((tm, f_out), jnp.float32)],   # h' accumulator
        ),
        compiler_params=pltpu.CompilerParams(
            dimension_semantics=("parallel", "arbitrary"),
            vmem_limit_bytes=vmem_limit,
        ),
    )(counts, f1, f2_row, adj_p, h)

    return out[:N]


# ---------------------------------------------------------------------------
# Reference + test
# ---------------------------------------------------------------------------
def _xavier_uniform(key, shape, gain):
    fan_in, fan_out = shape[0], shape[1]
    bound = gain * math.sqrt(6.0 / (fan_in + fan_out))
    return jax.random.uniform(key, shape, jnp.float32, minval=-bound, maxval=bound)


def _reference(x, adj, W, a, alpha):
    h = jnp.dot(x, W, precision=_HIGHEST)
    f_out = W.shape[1]
    e = (jnp.dot(h, a[:f_out], precision=_HIGHEST)
         + jnp.dot(h, a[f_out:], precision=_HIGHEST).T)
    e = jnp.where(e > 0, e, alpha * e)
    att = jnp.where(adj > 0, e, jnp.float32(-9e15))
    att = jax.nn.softmax(att, axis=1)
    hp = jnp.dot(att, h, precision=_HIGHEST)
    return jnp.where(hp > 0, hp, jnp.expm1(hp))


if __name__ == "__main__":
    N = 200          # number of graph nodes
    in_features = 16
    out_features = 32
    alpha = 0.2      # LeakyReLU negative slope
    gain = 1.414

    key = jax.random.PRNGKey(0)
    k_x, k_adj, k_w, k_a = jax.random.split(key, 4)

    x = jax.random.normal(k_x, (N, in_features), jnp.float32)
    adj = (jax.random.uniform(k_adj, (N, N)) > 0.5).astype(jnp.float32)
    adj = jnp.maximum(adj, jnp.eye(N, dtype=jnp.float32))   # self-loops: no empty rows
    W = _xavier_uniform(k_w, (in_features, out_features), gain)
    a = _xavier_uniform(k_a, (2 * out_features, 1), gain)

    ref = _reference(x, adj, W, a, alpha)

    # default tiling (single column tile at this size, resident h)
    out = jax.block_until_ready(gat_forward(x, adj, W, a, alpha=alpha))
    assert jnp.allclose(out, ref, atol=2e-3, rtol=2e-3), "mismatch (default tiling)"

    # small tiles: exercises multi-column online softmax + per-tile-count path
    out_small = jax.block_until_ready(
        gat_forward(x, adj, W, a, alpha=alpha, block_m=128, block_k=128))
    assert jnp.allclose(out_small, ref, atol=2e-3, rtol=2e-3), "mismatch (small tiling)"

    print("KERNEL_OK")
</pallas_src>

<mosaic_0001>
module attributes {stable_mosaic.version = 11 : i64} {
  func.func @_proj_kernel(%arg0: i32, %arg1: memref<128x16xf32, #tpu.memory_space<vmem>>, %arg2: memref<16x32xf32, #tpu.memory_space<vmem>>, %arg3: memref<32x128xf32, #tpu.memory_space<vmem>>, %arg4: memref<128x32xf32, #tpu.memory_space<vmem>>, %arg5: memref<128x128xf32, #tpu.memory_space<vmem>>) attributes {dimension_semantics = [#tpu.dimension_semantics<parallel>], iteration_bounds = array<i64: 2>, scalar_prefetch = 0 : i64, scratch_operands = 0 : i64, tpu.core_type = #tpu.core_type<tc>, window_params = [{transform_indices = @transform_0, window_bounds = array<i64: 128, 16>}, {pipeline_mode = #tpu.pipeline_mode<synchronous>, transform_indices = @transform_1, window_bounds = array<i64: 16, 32>}, {pipeline_mode = #tpu.pipeline_mode<synchronous>, transform_indices = @transform_2, window_bounds = array<i64: 32, 128>}, {transform_indices = @transform_3, window_bounds = array<i64: 128, 32>}, {transform_indices = @transform_4, window_bounds = array<i64: 128, 128>}]} {
    %c0 = arith.constant 0 : index
    %c0_0 = arith.constant 0 : index
    %0 = vector.load %arg1[%c0, %c0_0] : memref<128x16xf32, #tpu.memory_space<vmem>>, vector<128x16xf32>
    %c0_1 = arith.constant 0 : index
    %c0_2 = arith.constant 0 : index
    %1 = vector.load %arg2[%c0_1, %c0_2] : memref<16x32xf32, #tpu.memory_space<vmem>>, vector<16x32xf32>
    %cst = arith.constant dense<0.000000e+00> : vector<128x32xf32>
    %2 = tpu.matmul %0, %1, %cst {dimension_numbers = #tpu.dot_dimension_numbers<[1], [0], [0], [1], [0, 0, 1, 1], [], []>, precision = #tpu.contract_precision<fp32>} : vector<128x16xf32>, vector<16x32xf32>, vector<128x32xf32> -> vector<128x32xf32>
    %c0_3 = arith.constant 0 : index
    %c0_4 = arith.constant 0 : index
    %3 = vector.load %arg4[%c0_3, %c0_4] : memref<128x32xf32, #tpu.memory_space<vmem>>, vector<128x32xf32>
    tpu.vector_store %arg4[%c0_3, %c0_4], %2 {strides = array<i32>} : memref<128x32xf32, #tpu.memory_space<vmem>>, vector<128x32xf32>,
    %c0_5 = arith.constant 0 : index
    %c0_6 = arith.constant 0 : index
    %4 = vector.load %arg3[%c0_5, %c0_6] : memref<32x128xf32, #tpu.memory_space<vmem>>, vector<32x128xf32>
    %cst_7 = arith.constant dense<0.000000e+00> : vector<128x128xf32>
    %5 = tpu.matmul %2, %4, %cst_7 {dimension_numbers = #tpu.dot_dimension_numbers<[1], [0], [0], [1], [0, 0, 1, 1], [], []>, precision = #tpu.contract_precision<fp32>} : vector<128x32xf32>, vector<32x128xf32>, vector<128x128xf32> -> vector<128x128xf32>
    %c0_8 = arith.constant 0 : index
    %c0_9 = arith.constant 0 : index
    %6 = vector.load %arg5[%c0_8, %c0_9] : memref<128x128xf32, #tpu.memory_space<vmem>>, vector<128x128xf32>
    tpu.vector_store %arg5[%c0_8, %c0_9], %5 {strides = array<i32>} : memref<128x128xf32, #tpu.memory_space<vmem>>, vector<128x128xf32>,
    return
  }
  func.func @transform_0(%arg0: i32) -> (i32, i32) {
    %c0_i32 = arith.constant 0 : i32
    %c0_i32_0 = arith.constant 0 : i32
    return %arg0, %c0_i32 : i32, i32
  }
  func.func @transform_1(%arg0: i32) -> (i32, i32) {
    %c0_i32 = arith.constant 0 : i32
    %c0_i32_0 = arith.constant 0 : i32
    %c0_i32_1 = arith.constant 0 : i32
    return %c0_i32, %c0_i32_0 : i32, i32
  }
  func.func @transform_2(%arg0: i32) -> (i32, i32) {
    %c0_i32 = arith.constant 0 : i32
    %c0_i32_0 = arith.constant 0 : i32
    %c0_i32_1 = arith.constant 0 : i32
    return %c0_i32, %c0_i32_0 : i32, i32
  }
  func.func @transform_3(%arg0: i32) -> (i32, i32) {
    %c0_i32 = arith.constant 0 : i32
    %c0_i32_0 = arith.constant 0 : i32
    return %arg0, %c0_i32 : i32, i32
  }
  func.func @transform_4(%arg0: i32) -> (i32, i32) {
    %c0_i32 = arith.constant 0 : i32
    %c0_i32_0 = arith.constant 0 : i32
    return %arg0, %c0_i32 : i32, i32
  }
}

</mosaic_0001>

<bundles_post_ra>
// kernel: tpu_custom_call.1
= control target key start
LH: loop header
LB: loop body
LE: loop exit
PB: predicated region body
PF: predicated region fallthrough
CT: control target
= control target key end

     0   :  { %10 = vsyncpa [#allocation3], 0  ;;  %s4478_s0 = inlined_call_operand.vmem [shape: f32[256,16], index: 0, kind: input, shape index: {}]   ;;  %s4479_s1 = inlined_call_operand.vmem [shape: f32[16,32], index: 1, kind: input, shape index: {}]   ;;  %s4480_s2 = inlined_call_operand.vmem [shape: f32[32,128], index: 2, kind: input, shape index: {}]   ;;  %s4481_s3 = inlined_call_operand.vmem [shape: f32[256,32], index: 3, kind: output, shape index: {0}]   ;;  %s4482_s4 = inlined_call_operand.hbm [shape: f32[256,128], index: 4, kind: output, shape index: {1}]  }
   0x1   :  { %12 = vsyncpa [#allocation3 + $0x1], 0  ;;  %s3677_s15 = smov 0   ;;  %s3679_s16 = smov 0  }
   0x2   :  { %s3681_s17 = smov 0   ;;  %s3683_s18 = smov 0  }
   0x3 LB: > { %s3698_s19 = sadd.s32 4294967295, %s3647_s18   ;;  %s2709_s20 = sadd.s32 4294967294, %s3647_s18   ;;  %s3647_s18 = sphi %s3683_s18, %s4498_s18   ;;  %s3643_s17 = sphi %s3681_s17, %s4497_s17   ;;  %s3639_s16 = sphi %s3679_s16, %s4496_s16   ;;  %s3635_s15 = sphi %s3677_s15, %s4495_s15  }
   0x4   : > { %s3702_s21 = sadd.s32 1, %s3647_s18   ;;  %s119_s22 = sadd.s32 1, %s3643_s17 }
   0x5   : > { %s116_s23 = ssub.s32 %s3647_s18, %s3702_s21  ;;  %p129_p0 = scmp.ne.s32.totalorder %s3643_s17, %s3639_s16 }
   0x6   : > { %p117_p1 = scmp.eq.s32.totalorder %s116_s23, 0  ;;  %p130_p2 = scmp.eq.s32.totalorder %s3698_s19, 1 }
   0x7   : > { %p135_p3 = scmp.ne.s32.totalorder %s3639_s16, %s3635_s15  ;;  %p136_p4 = scmp.eq.s32.totalorder %s2709_s20, 1 }
   0x8   : > { %s3713_s24 = scalar_select %p117_p1, %s3643_s17, %s119_s22  }
   0x9   : > { %p3715_p5 = por %p130_p2, %p129_p0  ;;  %p3719_p6 = por %p136_p4, %p135_p3 }
   0xa   : > { %p2712_p7 = scmp.ge.s32.totalorder %s3647_s18, 1  ;;  %p169_p8 = scmp.lt.s32.totalorder %s3647_s18, 3 }
   0xc   : > { %p170_p9 = pnand %p2712_p7, %p169_p8 }
   0xd   : > { %v229_v0 = vld [vmem:[%s4479_s1] sm:$0xff] (!%p170_p9)  ;;  %v230_v1 = vld [vmem:[%s4479_s1 + $0x8] sm:$0xff] (!%p170_p9)  ;;  %s2714_s5 = sshll.u32 (!%p170_p9), %s3698_s19, 4  ;;  %vm231_vm0 = vcmask (!%p170_p9), 130048   ;;  %vm1384_vm1 = vcmask (!%p170_p9), 261120   ;;  %s197_s30 = sand.u32 (!%p170_p9), 1, %s3639_s16  }
   0xe   : > { %173 = sbr.rel (%p170_p9) target bundleno = 838 (0x346), region = 32  ;;  %v281_v2 = vand.u32 (!%p170_p9), 4294901760, %v229_v0  ;;  %v284_v3 = vand.u32 (!%p170_p9), 4294901760, %v230_v1  ;;  %p201_p10 = scmp.lt.s32.totalorder (!%p170_p9), %s2714_s5, 31 }
   0xf   : > { %s2723_s7 = sshll.u32 (!%p170_p9), %s3698_s19, 11  ;;  %s4437_s19 = scalar_lea.sflag (!%p170_p9), [#allocation3], %s197_s30 }
  0x10   : > { %v3732_v4 = vpack.c.bf16 (!%p170_p9), %v284_v3, %v281_v2  ;;  %v509_v5 = vsub.f32 (!%p170_p9), %v229_v0, %v281_v2  ;;  %v516_v6 = vsub.f32 (!%p170_p9), %v230_v1, %v284_v3  ;;  %s4429_s11 = scalar_lea.hbm (!%p170_p9), %s4482_s4, %s2723_s7  ;;  %s3649_s13 = smov (!%p170_p9), [#allocation2]  }
  0x11   : > { %s3589_s14 = sshll.u32 (!%p170_p9), %s3649_s13, 4  ;;  %s3590_s14 = int_to_ptr.vmem [resolvable:$false] %s3589_s14 }
  0x12   : > { %3313 = vmatprep.subr.bf16.mxu0 (!%p170_p9), %v3732_v4  ;;  %v510_v7 = vand.u32 (!%p170_p9), 4294901760, %v509_v5  ;;  %v517_v8 = vand.u32 (!%p170_p9), 4294901760, %v516_v6  ;;  %v3757_v21 = vpack.c.bf16 (!%p170_p9), %v516_v6, %v509_v5  ;;  %s3591_s20 = scalar_lea.vmem (!%p170_p9), %s3590_s14, 4096 }
  0x13   : > { %3315 = vmatpush3.bf16.msra.mxu0 (!%p170_p9), %v3732_v4 }
  0x14   : > { %v511_v10 = vsub.f32 (!%p170_p9), %v509_v5, %v510_v7  ;;  %v518_v11 = vsub.f32 (!%p170_p9), %v516_v6, %v517_v8  ;;  %v3749_v14 = vpack.c.bf16 (!%p170_p9), %v517_v8, %v510_v7 }
  0x15   : > { %s4500_s5 = smov (!%p201_p10, %s2714_s5), 31 }
  0x16   : > { %s2715_s6 = sshll.u32 %s4500_s5, 3  ;;  %v512_v23 = vand.u32 4294901760, %v511_v10  ;;  %v519_v24 = vand.u32 4294901760, %v518_v11  ;;  %s2713_s5 = sshll.u32 %s197_s30, 7 }
  0x17   : > { %s3744_s9 = scalar_lea.vmem %s4478_s0, %s2715_s6  ;;  %s4092_s29 = scalar_lea.vmem %s4481_s3, %s2715_s6 }
  0x18   : > { %v213_v9 = vld [vmem:[%s3744_s9] sm:$0xff]  ;;  %v214_v12 = vld [vmem:[%s3744_s9 + $0x8] sm:$0xff]  ;;  %v215_v13 = vld [vmem:[%s3744_s9 + $0x10] sm:$0xff]  ;;  %v3316_v32 = vpack.c.bf16 %v519_v24, %v512_v23  ;;  %s4408_s6 = scalar_lea.vmem [#allocation2], %s2713_s5 }
  0x19   : > { %v233_v15 = vsel %vm231_vm0, %v213_v9, 0  ;;  %v236_v16 = vsel %vm231_vm0, %v214_v12, 0  ;;  %v239_v17 = vsel %vm231_vm0, %v215_v13, 0  ;;  %v216_v18 = vld [vmem:[%s3744_s9 + $0x18] sm:$0xff]  ;;  %v217_v19 = vld [vmem:[%s3744_s9 + $0x20] sm:$0xff]  ;;  %v218_v20 = vld [vmem:[%s3744_s9 + $0x28] sm:$0xff] }
  0x1a   : > { %v3759_v22 = vand.u32 4294901760, %v233_v15  ;;  %v3761_v25 = vand.u32 4294901760, %v236_v16  ;;  %v219_v26 = vld [vmem:[%s3744_s9 + $0x30] sm:$0xff]  ;;  %v3764_v27 = vand.u32 4294901760, %v239_v17  ;;  %v242_v28 = vsel %vm231_vm0, %v216_v18, 0  ;;  %v220_v35 = vld [vmem:[%s3744_s9 + $0x38] sm:$0xff]  ;;  %3317 = vmatprep.subr.bf16.mxu0 %v3316_v32 }
  0x1b   : > { %v245_v29 = vsel %vm231_vm0, %v217_v19, 0  ;;  %v248_v30 = vsel %vm231_vm0, %v218_v20, 0  ;;  %v3775_v34 = vand.u32 4294901760, %v242_v28  ;;  %v251_v39 = vsel %vm231_vm0, %v219_v26, 0  ;;  %v221_v56 = vld [vmem:[%s3744_s9 + $0x40] sm:$0xff]  ;;  %v222_v57 = vld [vmem:[%s3744_s9 + $0x48] sm:$0xff] }
  0x1c   : > { %v3770_v31 = vsub.f32 %v233_v15, %v3759_v22  ;;  %v3773_v33 = vsub.f32 %v236_v16, %v3761_v25  ;;  %v3779_v36 = vsub.f32 %v239_v17, %v3764_v27  ;;  %v3781_v37 = vand.u32 4294901760, %v245_v29  ;;  %v223_v2 = vld [vmem:[%s3744_s9 + $0x50] sm:$0xff]  ;;  %v224_v3 = vld [vmem:[%s3744_s9 + $0x58] sm:$0xff]  ;;  %v225_v12 = vld [vmem:[%s3744_s9 + $0x60] sm:$0xff]  ;;  %s2622_s8 = sshll.u32 %s4408_s6, 4  ;;  %s4431_s8 = int_to_ptr.vmem [resolvable:$true] %s2622_s8 }
  0x1d   : > { %v3783_v38 = vand.u32 4294901760, %v248_v30  ;;  %v3789_v42 = vsub.f32 %v242_v28, %v3775_v34  ;;  %v3791_v43 = vand.u32 4294901760, %v251_v39  ;;  %v254_v47 = vsel %vm231_vm0, %v220_v35, 0  ;;  %v226_v13 = vld [vmem:[%s3744_s9 + $0x68] sm:$0xff]  ;;  %v227_v15 = vld [vmem:[%s3744_s9 + $0x70] sm:$0xff]  ;;  %v228_v35 = vld [vmem:[%s3744_s9 + $0x78] sm:$0xff]  ;;  %p3592_p0 = scmp.lt.s32.totalorder %s4431_s8, %s3590_s14 }
  0x1e   : > { %v349_v40 = vand.u32 4294901760, %v3770_v31  ;;  %v359_v41 = vand.u32 4294901760, %v3773_v33  ;;  %v369_v44 = vand.u32 4294901760, %v3779_v36  ;;  %v3795_v45 = vsub.f32 %v245_v29, %v3781_v37  ;;  %s3585_s12 = scalar_lea.vmem %s4431_s8, 2048 }
  0x1f   : > { %v3798_v46 = vsub.f32 %v248_v30, %v3783_v38  ;;  %v379_v50 = vand.u32 4294901760, %v3789_v42  ;;  %v3809_v51 = vsub.f32 %v251_v39, %v3791_v43  ;;  %v3816_v55 = vand.u32 4294901760, %v254_v47  ;;  %p3586_p11 = scmp.ne.s32.totalorder %s4431_s8, %s3585_s12  ;;  %p3593_p1 = scmp.lt.s32.totalorder %s3591_s20, %s3585_s12 }
  0x20   : > { %v350_v48 = vsub.f32 %v3770_v31, %v349_v40  ;;  %v360_v49 = vsub.f32 %v3773_v33, %v359_v41  ;;  %v370_v52 = vsub.f32 %v3779_v36, %v369_v44  ;;  %v389_v53 = vand.u32 4294901760, %v3795_v45 }
  0x21   : > { %v399_v54 = vand.u32 4294901760, %v3798_v46  ;;  %v380_v60 = vsub.f32 %v3789_v42, %v379_v50  ;;  %v409_v61 = vand.u32 4294901760, %v3809_v51  ;;  %v3831_v1 = vsub.f32 %v254_v47, %v3816_v55  ;;  %p3587_p12 = pnand %p3586_p11, %p3715_p5  ;;  %p3594_p2 = por %p3593_p1, %p3592_p0 }
  0x22   : > { %v351_v58 = vand.u32 4294901760, %v350_v48  ;;  %v361_v59 = vand.u32 4294901760, %v360_v49  ;;  %v371_v62 = vand.u32 4294901760, %v370_v52  ;;  %v390_v63 = vsub.f32 %v3795_v45, %v389_v53 }
  0x23   : > { %v400_v0 = vsub.f32 %v3798_v46, %v399_v54  ;;  %v381_v5 = vand.u32 4294901760, %v380_v60  ;;  %v257_v6 = vsel %vm231_vm0, %v221_v56, 0  ;;  %v260_v7 = vsel %vm231_vm0, %v222_v57, 0  ;;  %p3588_p13 = pneg %p3587_p12 }
  0x24   : > { %2956 = vmatprep.mubr.f32.mxu0 %v351_v58  ;;  %v391_v8 = vand.u32 4294901760, %v390_v63  ;;  %v410_v9 = vsub.f32 %v3809_v51, %v409_v61  ;;  %v419_v10 = vand.u32 4294901760, %v3831_v1  ;;  %v3841_v11 = vand.u32 4294901760, %v257_v6 }
  0x25   : > { %2957 = vmatmul.mubr.f32.vlgmr.msra.gmra.mrb[0].mxu0 %v361_v59  ;;  %v401_v16 = vand.u32 4294901760, %v400_v0  ;;  %v3846_v17 = vand.u32 4294901760, %v260_v7  ;;  %v263_v18 = vsel %vm231_vm0, %v223_v2, 0  ;;  %v266_v19 = vsel %vm231_vm0, %v224_v3, 0  ;;  %p3595_p3 = pnand %p3594_p2, %p3588_p13 }
  0x26   : > { %3319 = vmatpush3.bf16.msra.mxu0 %v3316_v32  ;;  %2959 = vmatprep.mubr.f32.mxu0 %v371_v62  ;;  %v420_v20 = vsub.f32 %v3831_v1, %v419_v10  ;;  %v3854_v23 = vsub.f32 %v257_v6, %v3841_v11  ;;  %v3856_v24 = vand.u32 4294901760, %v263_v18  ;;  %v3858_v26 = vand.u32 4294901760, %v266_v19 }
  0x27   : > { %3321 = vmatprep.subr.bf16.mxu0 %v3757_v21  ;;  %v3862_v28 = vsub.f32 %v260_v7, %v3846_v17  ;;  %v269_v29 = vsel %vm231_vm0, %v225_v12, 0  ;;  %v272_v30 = vsel %vm231_vm0, %v226_v13, 0  ;;  %v275_v32 = vsel %vm231_vm0, %v227_v15, 0 }
  0x28   : > { %v411_v39 = vand.u32 4294901760, %v410_v9  ;;  %v429_v47 = vand.u32 4294901760, %v3854_v23  ;;  %v3870_v48 = vsub.f32 %v263_v18, %v3856_v24  ;;  %v3873_v49 = vsub.f32 %v266_v19, %v3858_v26 }
  0x29   : > { %2960 = vmatmul.mubr.f32.gmra.mrb[2].mxu0 %v381_v5  ;;  %v439_v52 = vand.u32 4294901760, %v3862_v28  ;;  %v3876_v56 = vand.u32 4294901760, %v269_v29  ;;  %v3878_v57 = vand.u32 4294901760, %v272_v30  ;;  %v3880_v58 = vand.u32 4294901760, %v275_v32 }
  0x2a   : > { %2962 = vmatprep.mubr.f32.mxu0 %v391_v8  ;;  %v430_v59 = vsub.f32 %v3854_v23, %v429_v47  ;;  %v449_v60 = vand.u32 4294901760, %v3870_v48  ;;  %v278_v62 = vsel %vm231_vm0, %v228_v35, 0  ;;  %v421_v63 = vand.u32 4294901760, %v420_v20 }
  0x2b   : > { %v3888_v0 = vsub.f32 %v269_v29, %v3876_v56  ;;  %v440_v2 = vsub.f32 %v3862_v28, %v439_v52  ;;  %v459_v3 = vand.u32 4294901760, %v3873_v49  ;;  %v3895_v5 = vsub.f32 %v272_v30, %v3878_v57 }
  0x2c   : > { %v3897_v6 = vand.u32 4294901760, %v278_v62  ;;  %v431_v7 = vand.u32 4294901760, %v430_v59  ;;  %v450_v8 = vsub.f32 %v3870_v48, %v449_v60  ;;  %v3904_v12 = vsub.f32 %v275_v32, %v3880_v58 }
  0x2d   : > { %2963 = vmatmul.mubr.f32.gmra.mrb[4].mxu0 %v401_v16  ;;  %v469_v9 = vand.u32 4294901760, %v3888_v0  ;;  %v441_v13 = vand.u32 4294901760, %v440_v2  ;;  %v460_v15 = vsub.f32 %v3873_v49, %v459_v3  ;;  %v479_v16 = vand.u32 4294901760, %v3895_v5 }
  0x2e   : > { %2965 = vmatprep.mubr.f32.mxu0 %v411_v39  ;;  %v3911_v18 = vsub.f32 %v278_v62, %v3897_v6  ;;  %v451_v19 = vand.u32 4294901760, %v450_v8  ;;  %v489_v29 = vand.u32 4294901760, %v3904_v12 }
  0x2f   : > { %v470_v20 = vsub.f32 %v3888_v0, %v469_v9  ;;  %v461_v30 = vand.u32 4294901760, %v460_v15  ;;  %v480_v32 = vsub.f32 %v3895_v5, %v479_v16 }
  0x30   : > { %v499_v35 = vand.u32 4294901760, %v3911_v18  ;;  %v490_v59 = vsub.f32 %v3904_v12, %v489_v29 }
  0x31   : > { %2966 = vmatmul.mubr.f32.gmra.mrb[6].mxu0 %v421_v63  ;;  %v471_v39 = vand.u32 4294901760, %v470_v20  ;;  %v481_v62 = vand.u32 4294901760, %v480_v32 }
  0x32   : > { %2968 = vmatprep.mubr.f32.mxu0 %v431_v7  ;;  %v500_v63 = vsub.f32 %v3911_v18, %v499_v35  ;;  %v491_v2 = vand.u32 4294901760, %v490_v59 }
  0x34   : > { %v501_v7 = vand.u32 4294901760, %v500_v63 }
  0x35   : > { %2969 = vmatmul.mubr.f32.gmra.mrb[8].mxu0 %v441_v13 }
  0x36   : > { %2971 = vmatprep.mubr.f32.mxu0 %v451_v19 }
  0x39   : > { %2972 = vmatmul.mubr.f32.gmra.mrb[10].mxu0 %v461_v30 }
  0x3a   : > { %2974 = vmatprep.mubr.f32.mxu0 %v471_v39 }
  0x3d   : > { %2975 = vmatmul.mubr.f32.gmra.mrb[12].mxu0 %v481_v62 }
  0x3e   : > { %2977 = vmatprep.mubr.f32.mxu0 %v491_v2 }
  0x41   : > { %2978 = vmatmul.mubr.f32.gmra.mrb[14].mxu0 %v501_v7 }
  0x42   : > { %2984 = vmatprep.mubr.f32.mxu0 %v3759_v22 }
  0x45   : > { %2985 = vmatmul.mubr.f32.vlgmr.msra.gmra.mrb[0].mxu0 %v3761_v25 }
  0x46   : > { %3323 = vmatpush3.bf16.msra.mxu0 %v3757_v21  ;;  %2987 = vmatprep.mubr.f32.mxu0 %v3764_v27 }
  0x47   : > { %3325 = vmatprep.subr.bf16.mxu0 %v3732_v4 }
  0x49   : > { %2988 = vmatmul.mubr.f32.gmra.mrb[2].mxu0 %v3775_v34 }
  0x4a   : > { %2990 = vmatprep.mubr.f32.mxu0 %v3781_v37 }
  0x4d   : > { %2991 = vmatmul.mubr.f32.gmra.mrb[4].mxu0 %v3783_v38 }
  0x4e   : > { %2993 = vmatprep.mubr.f32.mxu0 %v3791_v43 }
  0x51   : > { %2994 = vmatmul.mubr.f32.gmra.mrb[6].mxu0 %v3816_v55 }
  0x52   : > { %2996 = vmatprep.mubr.f32.mxu0 %v3841_v11 }
  0x55   : > { %2997 = vmatmul.mubr.f32.gmra.mrb[8].mxu0 %v3846_v17 }
  0x56   : > { %2999 = vmatprep.mubr.f32.mxu0 %v3856_v24 }
  0x59   : > { %3000 = vmatmul.mubr.f32.gmra.mrb[10].mxu0 %v3858_v26 }
  0x5a   : > { %3002 = vmatprep.mubr.f32.mxu0 %v3876_v56 }
  0x5d   : > { %3003 = vmatmul.mubr.f32.gmra.mrb[12].mxu0 %v3878_v57 }
  0x5e   : > { %3005 = vmatprep.mubr.f32.mxu0 %v3880_v58 }
  0x61   : > { %3006 = vmatmul.mubr.f32.gmra.mrb[14].mxu0 %v3897_v6 }
  0x62   : > { %3012 = vmatprep.mubr.f32.mxu0 %v3770_v31  ;;  %v1404_v31 = vld [vmem:[%s4480_s2 + $0x18] sm:$0xff] }
  0x65   : > { %3013 = vmatmul.mubr.f32.vlgmr.msra.gmra.mrb[0].mxu0 %v3773_v33 }
  0x66   : > { %3327 = vmatpush3.bf16.msra.mxu0 %v3732_v4  ;;  %3015 = vmatprep.mubr.f32.mxu0 %v3779_v36 }
  0x67   : > { %3329 = vmatprep.subr.bf16.mxu0 %v3749_v14 }
  0x69   : > { %3016 = vmatmul.mubr.f32.gmra.mrb[2].mxu0 %v3789_v42 }
  0x6a   : > { %3018 = vmatprep.mubr.f32.mxu0 %v3795_v45 }
  0x6d   : > { %3019 = vmatmul.mubr.f32.gmra.mrb[4].mxu0 %v3798_v46 }
  0x6e   : > { %3021 = vmatprep.mubr.f32.mxu0 %v3809_v51 }
  0x71   : > { %3022 = vmatmul.mubr.f32.gmra.mrb[6].mxu0 %v3831_v1 }
  0x72   : > { %3024 = vmatprep.mubr.f32.mxu0 %v3854_v23 }
  0x75   : > { %3025 = vmatmul.mubr.f32.gmra.mrb[8].mxu0 %v3862_v28 }
  0x76   : > { %3027 = vmatprep.mubr.f32.mxu0 %v3870_v48 }
  0x79   : > { %3028 = vmatmul.mubr.f32.gmra.mrb[10].mxu0 %v3873_v49 }
  0x7a   : > { %3030 = vmatprep.mubr.f32.mxu0 %v3888_v0 }
  0x7d   : > { %3031 = vmatmul.mubr.f32.gmra.mrb[12].mxu0 %v3895_v5 }
  0x7e   : > { %3033 = vmatprep.mubr.f32.mxu0 %v3904_v12 }
  0x81   : > { %3034 = vmatmul.mubr.f32.gmra.mrb[14].mxu0 %v3911_v18 }
  0x82   : > { %3040 = vmatprep.mubr.f32.mxu0 %v349_v40 }
  0x85   : > { %3041 = vmatmul.mubr.f32.vlgmr.msra.gmra.mrb[0].mxu0 %v359_v41 }
  0x86   : > { %3331 = vmatpush3.bf16.msra.mxu0 %v3749_v14  ;;  %3043 = vmatprep.mubr.f32.mxu0 %v369_v44  ;;  %v1402_v14 = vld [vmem:[%s4480_s2 + $0x8] sm:$0xff] }
  0x87   : > { %3333 = vmatprep.subr.bf16.mxu0 %v3732_v4 }
  0x89   : > { %3044 = vmatmul.mubr.f32.gmra.mrb[2].mxu0 %v379_v50 }
  0x8a   : > { %3046 = vmatprep.mubr.f32.mxu0 %v389_v53 }
  0x8d   : > { %3047 = vmatmul.mubr.f32.gmra.mrb[4].mxu0 %v399_v54 }
  0x8e   : > { %3049 = vmatprep.mubr.f32.mxu0 %v409_v61 }
  0x91   : > { %3050 = vmatmul.mubr.f32.gmra.mrb[6].mxu0 %v419_v10 }
  0x92   : > { %3052 = vmatprep.mubr.f32.mxu0 %v429_v47 }
  0x95   : > { %3053 = vmatmul.mubr.f32.gmra.mrb[8].mxu0 %v439_v52 }
  0x96   : > { %3055 = vmatprep.mubr.f32.mxu0 %v449_v60 }
  0x99   : > { %3056 = vmatmul.mubr.f32.gmra.mrb[10].mxu0 %v459_v3 }
  0x9a   : > { %3058 = vmatprep.mubr.f32.mxu0 %v469_v9 }
  0x9d   : > { %3059 = vmatmul.mubr.f32.gmra.mrb[12].mxu0 %v479_v16 }
  0x9e   : > { %3061 = vmatprep.mubr.f32.mxu0 %v489_v29 }
  0xa1   : > { %3062 = vmatmul.mubr.f32.gmra.mrb[14].mxu0 %v499_v35 }
  0xa2   : > { %3068 = vmatprep.mubr.f32.mxu0 %v3759_v22 }
  0xa5   : > { %3069 = vmatmul.mubr.f32.vlgmr.msra.gmra.mrb[0].mxu0 %v3761_v25 }
  0xa6   : > { %3335 = vmatpush3.bf16.msra.mxu0 %v3732_v4  ;;  %3071 = vmatprep.mubr.f32.mxu0 %v3764_v27  ;;  %v1401_v4 = vld [vmem:[%s4480_s2] sm:$0xff] }
  0xa7   : > { %v1454_v21 = vand.u32 4294901760, %v1401_v4 }
  0xa9   : > { %3072 = vmatmul.mubr.f32.gmra.mrb[2].mxu0 %v3775_v34 }
  0xaa   : > { %3074 = vmatprep.mubr.f32.mxu0 %v3781_v37 }
  0xad   : > { %3075 = vmatmul.mubr.f32.gmra.mrb[4].mxu0 %v3783_v38 }
  0xae   : > { %3077 = vmatprep.mubr.f32.mxu0 %v3791_v43 }
  0xb1   : > { %3078 = vmatmul.mubr.f32.gmra.mrb[6].mxu0 %v3816_v55 }
  0xb2   : > { %3080 = vmatprep.mubr.f32.mxu0 %v3841_v11 }
  0xb5   : > { %3081 = vmatmul.mubr.f32.gmra.mrb[8].mxu0 %v3846_v17 }
  0xb6   : > { %3083 = vmatprep.mubr.f32.mxu0 %v3856_v24 }
  0xb9   : > { %3084 = vmatmul.mubr.f32.gmra.mrb[10].mxu0 %v3858_v26 }
  0xba   : > { %3086 = vmatprep.mubr.f32.mxu0 %v3876_v56 }
  0xbd   : > { %3087 = vmatmul.mubr.f32.gmra.mrb[12].mxu0 %v3878_v57 }
  0xbe   : > { %3089 = vmatprep.mubr.f32.mxu0 %v3880_v58 }
  0xc1   : > { %3090 = vmatmul.mubr.f32.gmra.mrb[14].mxu0 %v3897_v6 }
  0xc2   : > { %3096 = vmatprep.mubr.f32.mxu0 %v3759_v22  ;;  %v1457_v22 = vand.u32 4294901760, %v1402_v14 }
  0xc5   : > { %3097 = vmatmul.mubr.f32.vlgmr.msra.gmra.mrb[0].mxu0 %v3761_v25  ;;  %v4036_v25 = vpack.c.bf16 %v1457_v22, %v1454_v21 }
  0xc6   : > { %3099 = vmatprep.mubr.f32.mxu0 %v3764_v27  ;;  %v1403_v27 = vld [vmem:[%s4480_s2 + $0x10] sm:$0xff] }
  0xc7   : > { %3337 = vmatprep.subr.bf16.mxu1 %v4036_v25  ;;  %v1460_v33 = vand.u32 4294901760, %v1403_v27 }
  0xc8   : > { %3339 = vmatpush3.bf16.msra.mxu1 %v4036_v25 }
  0xc9   : > { %3100 = vmatmul.mubr.f32.gmra.mrb[2].mxu0 %v3775_v34  ;;  %v1463_v34 = vand.u32 4294901760, %v1404_v31  ;;  %v4065_v50 = vsub.f32 %v1403_v27, %v1460_v33 }
  0xca   : > { %3102 = vmatprep.mubr.f32.mxu0 %v3781_v37  ;;  %v4050_v37 = vsub.f32 %v1401_v4, %v1454_v21 }
  0xcb   : > { %v4046_v36 = vpack.c.bf16 %v1463_v34, %v1460_v33  ;;  %v4067_v51 = vsub.f32 %v1404_v31, %v1463_v34  ;;  %v1699_v53 = vand.u32 4294901760, %v4065_v50 }
  0xcc   : > { %v1685_v40 = vand.u32 4294901760, %v4050_v37 }
  0xcd   : > { %3103 = vmatmul.mubr.f32.gmra.mrb[4].mxu0 %v3783_v38  ;;  %3341 = vmatprep.subr.bf16.mxu1 %v4046_v36  ;;  %v4052_v38 = vsub.f32 %v1402_v14, %v1457_v22  ;;  %v1706_v54 = vand.u32 4294901760, %v4067_v51  ;;  %v4085_v23 = vpack.c.bf16 %v4067_v51, %v4065_v50 }
  0xce   : > { %3105 = vmatprep.mubr.f32.mxu0 %v3791_v43  ;;  %3343 = vmatpush3.bf16.msra.mxu1 %v4046_v36  ;;  %v1686_v42 = vsub.f32 %v4050_v37, %v1685_v40 }
  0xcf   : > { %v1692_v41 = vand.u32 4294901760, %v4052_v38  ;;  %v1707_v61 = vsub.f32 %v4067_v51, %v1706_v54 }
  0xd0   : > { %v1687_v44 = vand.u32 4294901760, %v1686_v42 }
  0xd1   : > { %3106 = vmatmul.mubr.f32.gmra.mrb[6].mxu0 %v3816_v55  ;;  %v1693_v43 = vsub.f32 %v4052_v38, %v1692_v41  ;;  %v1700_v55 = vsub.f32 %v4065_v50, %v1699_v53  ;;  %v1708_v10 = vand.u32 4294901760, %v1707_v61 }
  0xd2   : > { %3108 = vmatprep.mubr.f32.mxu0 %v3841_v11 }
  0xd3   : > { %v1694_v45 = vand.u32 4294901760, %v1693_v43  ;;  %v1701_v1 = vand.u32 4294901760, %v1700_v55 }
  0xd5   : > { %3109 = vmatmul.mubr.f32.gmra.mrb[8].mxu0 %v3846_v17  ;;  %v4062_v46 = vpack.c.bf16 %v1694_v45, %v1687_v44  ;;  %v4077_v11 = vpack.c.bf16 %v1708_v10, %v1701_v1  ;;  %v4081_v17 = vpack.c.bf16 %v4052_v38, %v4050_v37  ;;  %v3372_v37 = vpack.c.bf16 %v1706_v54, %v1699_v53 }
  0xd6   : > { %3111 = vmatprep.mubr.f32.mxu0 %v3856_v24 }
  0xd7   : > { %3345 = vmatprep.subr.bf16.mxu1 %v4062_v46 }
  0xd9   : > { %3112 = vmatmul.mubr.f32.gmra.mrb[10].mxu0 %v3858_v26 }
  0xda   : > { %3114 = vmatprep.mubr.f32.mxu0 %v3876_v56 }
  0xdd   : > { %3115 = vmatmul.mubr.f32.gmra.mrb[12].mxu0 %v3878_v57 }
  0xde   : > { %3117 = vmatprep.mubr.f32.mxu0 %v3880_v58 }
  0xe1   : > { %3118 = vmatmul.mubr.f32.gmra.mrb[14].mxu0 %v3897_v6 }
 0x198   : > { %v3098_v24 = vpop.f32.mrb[0].mxu0 }
 0x199   : > { %1386 = vst.msk [vmem:[%s4092_s29 + $0x8] sm:$0xff] %vm1384_vm1, %v3098_v24  ;;  %v1409_v26 = vsel %vm1384_vm1, %v3098_v24, 0  ;;  %v1290_v28 = vpop.f32.mrb[1].mxu0 }
 0x19a   : > { %v4097_v47 = vand.u32 4294901760, %v1409_v26  ;;  %1385 = vst.msk [vmem:[%s4092_s29] sm:$0xff] %vm1384_vm1, %v1290_v28  ;;  %v1406_v48 = vsel %vm1384_vm1, %v1290_v28, 0 }
 0x19b   : > { %v4102_v49 = vand.u32 4294901760, %v1406_v48 }
 0x19c   : > { %v4105_v52 = vsub.f32 %v1409_v26, %v4097_v47  ;;  %v3101_v56 = vpop.f32.mrb[2].mxu0 }
 0x19d   : > { %v4108_v57 = vsub.f32 %v1406_v48, %v4102_v49  ;;  %1388 = vst.msk [vmem:[%s4092_s29 + $0x18] sm:$0xff] %vm1384_vm1, %v3101_v56  ;;  %v1415_v58 = vsel %vm1384_vm1, %v3101_v56, 0  ;;  %v1302_v60 = vpop.f32.mrb[3].mxu0 }
 0x19e   : > { %v4113_v0 = vand.u32 4294901760, %v1415_v58  ;;  %1387 = vst.msk [vmem:[%s4092_s29 + $0x10] sm:$0xff] %vm1384_vm1, %v1302_v60  ;;  %v1412_v3 = vsel %vm1384_vm1, %v1302_v60, 0  ;;  %v1534_v5 = vand.u32 4294901760, %v4105_v52 }
 0x19f   : > { %v4119_v6 = vand.u32 4294901760, %v1412_v3  ;;  %v1524_v8 = vand.u32 4294901760, %v4108_v57 }
 0x1a0   : > { %v4123_v9 = vsub.f32 %v1415_v58, %v4113_v0  ;;  %v3104_v12 = vpop.f32.mrb[4].mxu0  ;;  %v1535_v13 = vsub.f32 %v4105_v52, %v1534_v5 }
 0x1a1   : > { %v4129_v15 = vsub.f32 %v1412_v3, %v4119_v6  ;;  %1390 = vst.msk [vmem:[%s4092_s29 + $0x28] sm:$0xff] %vm1384_vm1, %v3104_v12  ;;  %v1421_v16 = vsel %vm1384_vm1, %v3104_v12, 0  ;;  %v1314_v18 = vpop.f32.mrb[5].mxu0  ;;  %v1525_v19 = vsub.f32 %v4108_v57, %v1524_v8 }
 0x1a2   : > { %v4137_v20 = vand.u32 4294901760, %v1421_v16  ;;  %1389 = vst.msk [vmem:[%s4092_s29 + $0x20] sm:$0xff] %vm1384_vm1, %v1314_v18  ;;  %v1418_v29 = vsel %vm1384_vm1, %v1314_v18, 0  ;;  %v1554_v30 = vand.u32 4294901760, %v4123_v9  ;;  %v1536_v63 = vand.u32 4294901760, %v1535_v13 }
 0x1a3   : > { %v4143_v32 = vand.u32 4294901760, %v1418_v29  ;;  %v1526_v35 = vand.u32 4294901760, %v1525_v19  ;;  %v1544_v39 = vand.u32 4294901760, %v4129_v15 }
 0x1a4   : > { %v4147_v59 = vsub.f32 %v1421_v16, %v4137_v20  ;;  %v3107_v62 = vpop.f32.mrb[6].mxu0  ;;  %v1555_v2 = vsub.f32 %v4123_v9, %v1554_v30 }
 0x1a5   : > { %v4153_v7 = vsub.f32 %v1418_v29, %v4143_v32  ;;  %1392 = vst.msk [vmem:[%s4092_s29 + $0x38] sm:$0xff] %vm1384_vm1, %v3107_v62  ;;  %v1427_v4 = vsel %vm1384_vm1, %v3107_v62, 0  ;;  %v1326_v14 = vpop.f32.mrb[7].mxu0  ;;  %3128 = vmatprep.mubr.f32.mxu1 %v1526_v35  ;;  %v1545_v21 = vsub.f32 %v4129_v15, %v1544_v39 }
 0x1a6   : > { %v4161_v22 = vand.u32 4294901760, %v1427_v4  ;;  %1391 = vst.msk [vmem:[%s4092_s29 + $0x30] sm:$0xff] %vm1384_vm1, %v1326_v14  ;;  %v1424_v27 = vsel %vm1384_vm1, %v1326_v14, 0  ;;  %3129 = vmatmul.mubr.f32.vlgmr.msra.gmra.mrb[0].mxu1 %v1536_v63  ;;  %v1574_v31 = vand.u32 4294901760, %v4147_v59  ;;  %v1556_v45 = vand.u32 4294901760, %v1555_v2 }
 0x1a7   : > { %v4167_v33 = vand.u32 4294901760, %v1424_v27  ;;  %3347 = vmatpush3.bf16.msra.mxu1 %v4062_v46  ;;  %v1546_v34 = vand.u32 4294901760, %v1545_v21  ;;  %v1564_v42 = vand.u32 4294901760, %v4153_v7 }
 0x1a8   : > { %v4172_v43 = vsub.f32 %v1427_v4, %v4161_v22  ;;  %v3110_v44 = vpop.f32.mrb[8].mxu0  ;;  %v1575_v55 = vsub.f32 %v4147_v59, %v1574_v31  ;;  %3349 = vmatprep.subr.bf16.mxu1 %v4077_v11 }
 0x1a9   : > { %v4179_v61 = vsub.f32 %v1424_v27, %v4167_v33  ;;  %1394 = vst.msk [vmem:[%s4092_s29 + $0x48] sm:$0xff] %vm1384_vm1, %v3110_v44  ;;  %v1433_v46 = vsel %vm1384_vm1, %v3110_v44, 0  ;;  %v1338_v1 = vpop.f32.mrb[9].mxu0  ;;  %3131 = vmatprep.mubr.f32.mxu1 %v1546_v34  ;;  %v1565_v10 = vsub.f32 %v4153_v7, %v1564_v42 }
 0x1aa   : > { %v4187_v24 = vand.u32 4294901760, %v1433_v46  ;;  %1393 = vst.msk [vmem:[%s4092_s29 + $0x40] sm:$0xff] %vm1384_vm1, %v1338_v1  ;;  %v1430_v26 = vsel %vm1384_vm1, %v1338_v1, 0  ;;  %3132 = vmatmul.mubr.f32.gmra.mrb[2].mxu1 %v1556_v45  ;;  %v1594_v28 = vand.u32 4294901760, %v4172_v43  ;;  %v1576_v12 = vand.u32 4294901760, %v1575_v55 }
 0x1ab   : > { %v4193_v48 = vand.u32 4294901760, %v1430_v26  ;;  %v1566_v56 = vand.u32 4294901760, %v1565_v10  ;;  %v1584_v58 = vand.u32 4294901760, %v4179_v61  ;;  %3351 = vmatpush3.bf16.msra.mxu1 %v4077_v11 }
 0x1ac   : > { %v4198_v60 = vsub.f32 %v1433_v46, %v4187_v24  ;;  %v3113_v3 = vpop.f32.mrb[10].mxu0  ;;  %v1595_v13 = vsub.f32 %v4172_v43, %v1594_v28  ;;  %3353 = vmatprep.subr.bf16.mxu1 %v4081_v17 }
 0x1ad   : > { %v4205_v16 = vsub.f32 %v1430_v26, %v4193_v48  ;;  %1396 = vst.msk [vmem:[%s4092_s29 + $0x58] sm:$0xff] %vm1384_vm1, %v3113_v3  ;;  %v1439_v18 = vsel %vm1384_vm1, %v3113_v3, 0  ;;  %v1350_v19 = vpop.f32.mrb[11].mxu0  ;;  %3134 = vmatprep.mubr.f32.mxu1 %v1566_v56  ;;  %v1585_v11 = vsub.f32 %v4179_v61, %v1584_v58 }
 0x1ae   : > { %v4213_v29 = vand.u32 4294901760, %v1439_v18  ;;  %1395 = vst.msk [vmem:[%s4092_s29 + $0x50] sm:$0xff] %vm1384_vm1, %v1350_v19  ;;  %v1436_v35 = vsel %vm1384_vm1, %v1350_v19, 0  ;;  %3135 = vmatmul.mubr.f32.gmra.mrb[4].mxu1 %v1576_v12  ;;  %v4485_v62 = vand.u32 4294901760, %v4198_v60  ;;  %v1596_v27 = vand.u32 4294901760, %v1595_v13 }
 0x1af   : > { %v4219_v63 = vand.u32 4294901760, %v1436_v35  ;;  %v1586_v2 = vand.u32 4294901760, %v1585_v11  ;;  %v4486_v4 = vand.u32 4294901760, %v4205_v16  ;;  %v4490_v38 = vand.u32 4294901760, %v4205_v16 }
 0x1b0   : > { %v4223_v14 = vsub.f32 %v1439_v18, %v4213_v29  ;;  %v3116_v21 = vpop.f32.mrb[12].mxu0  ;;  %v1615_v34 = vsub.f32 %v4198_v60, %v4485_v62 }
 0x1b1   : > { %v4229_v44 = vsub.f32 %v1436_v35, %v4219_v63  ;;  %1398 = vst.msk [vmem:[%s4092_s29 + $0x68] sm:$0xff] %vm1384_vm1, %v3116_v21  ;;  %v1445_v45 = vsel %vm1384_vm1, %v3116_v21, 0  ;;  %v1362_v55 = vpop.f32.mrb[13].mxu0  ;;  %3137 = vmatprep.mubr.f32.mxu1 %v1586_v2  ;;  %v1605_v46 = vsub.f32 %v4205_v16, %v4486_v4 }
 0x1b2   : > { %v4237_v1 = vand.u32 4294901760, %v1445_v45  ;;  %1397 = vst.msk [vmem:[%s4092_s29 + $0x60] sm:$0xff] %vm1384_vm1, %v1362_v55  ;;  %v1442_v10 = vsel %vm1384_vm1, %v1362_v55, 0  ;;  %3138 = vmatmul.mubr.f32.gmra.mrb[6].mxu1 %v1596_v27  ;;  %v4483_v26 = vand.u32 4294901760, %v4223_v14  ;;  %v1616_v19 = vand.u32 4294901760, %v1615_v34 }
 0x1b3   : > { %v4243_v56 = vand.u32 4294901760, %v1442_v10  ;;  %v1606_v3 = vand.u32 4294901760, %v1605_v46  ;;  %v4484_v12 = vand.u32 4294901760, %v4229_v44  ;;  %v4493_v50 = vand.u32 4294901760, %v4223_v14 }
 0x1b4   : > { %v4247_v13 = vsub.f32 %v1445_v45, %v4237_v1  ;;  %v3119_v18 = vpop.f32.mrb[14].mxu0  ;;  %v1635_v11 = vsub.f32 %v4223_v14, %v4483_v26 }
 0x1b5   : > { %v4253_v35 = vsub.f32 %v1442_v10, %v4243_v56  ;;  %1400 = vst.msk [vmem:[%s4092_s29 + $0x78] sm:$0xff] %vm1384_vm1, %v3119_v18  ;;  %v1451_v2 = vsel %vm1384_vm1, %v3119_v18, 0  ;;  %v1374_v21 = vpop.f32.mrb[15].mxu0  ;;  %3140 = vmatprep.mubr.f32.mxu1 %v1606_v3  ;;  %v1625_v27 = vsub.f32 %v4229_v44, %v4484_v12 }
 0x1b6   : > { %v4261_v45 = vand.u32 4294901760, %v1451_v2  ;;  %1399 = vst.msk [vmem:[%s4092_s29 + $0x70] sm:$0xff] %vm1384_vm1, %v1374_v21  ;;  %v1448_v34 = vsel %vm1384_vm1, %v1374_v21, 0  ;;  %3141 = vmatmul.mubr.f32.gmra.mrb[8].mxu1 %v1616_v19  ;;  %v4487_v55 = vand.u32 4294901760, %v4247_v13  ;;  %v1636_v26 = vand.u32 4294901760, %v1635_v11 }
 0x1b7   : > { %v4267_v46 = vand.u32 4294901760, %v1448_v34  ;;  %v1626_v10 = vand.u32 4294901760, %v1625_v27  ;;  %v1644_v18 = vand.u32 4294901760, %v4253_v35  ;;  %v4494_v51 = vand.u32 4294901760, %v4247_v13 }
 0x1b8   : > { %v4271_v3 = vsub.f32 %v1451_v2, %v4261_v45  ;;  %v1655_v12 = vsub.f32 %v4247_v13, %v4487_v55 }
 0x1b9   : > { %v4277_v62 = vsub.f32 %v1448_v34, %v4267_v46  ;;  %3143 = vmatprep.mubr.f32.mxu1 %v1626_v10  ;;  %v1645_v19 = vsub.f32 %v4253_v35, %v1644_v18 }
 0x1ba   : > { %3144 = vmatmul.mubr.f32.gmra.mrb[10].mxu1 %v1636_v26  ;;  %v1674_v21 = vand.u32 4294901760, %v4271_v3  ;;  %v1656_v4 = vand.u32 4294901760, %v1655_v12 }
 0x1bb   : > { %v1664_v27 = vand.u32 4294901760, %v4277_v62  ;;  %v1646_v2 = vand.u32 4294901760, %v1645_v19 }
 0x1bc   : > { %v1675_v11 = vsub.f32 %v4271_v3, %v1674_v21 }
 0x1bd   : > { %3146 = vmatprep.mubr.f32.mxu1 %v1646_v2  ;;  %v1665_v34 = vsub.f32 %v4277_v62, %v1664_v27 }
 0x1be   : > { %3147 = vmatmul.mubr.f32.gmra.mrb[12].mxu1 %v1656_v4  ;;  %v1676_v55 = vand.u32 4294901760, %v1675_v11 }
 0x1bf   : > { %v1666_v10 = vand.u32 4294901760, %v1665_v34 }
 0x1c1   : > { %3149 = vmatprep.mubr.f32.mxu1 %v1666_v10 }
 0x1c2   : > { %3150 = vmatmul.mubr.f32.gmra.mrb[14].mxu1 %v1676_v55 }
 0x1c3   : > { %3160 = vmatprep.mubr.f32.mxu1 %v4102_v49 }
 0x1c6   : > { %3161 = vmatmul.mubr.f32.vlgmr.msra.gmra.mrb[0].mxu1 %v4097_v47 }
 0x1c7   : > { %3355 = vmatpush3.bf16.msra.mxu1 %v4081_v17  ;;  %3163 = vmatprep.mubr.f32.mxu1 %v4119_v6  ;;  %v3368_v17 = vpack.c.bf16 %v1692_v41, %v1685_v40  ;;  %v4491_v40 = vand.u32 4294901760, %v4198_v60  ;;  %v4492_v41 = vand.u32 4294901760, %v4229_v44 }
 0x1c8   : > { %3357 = vmatprep.subr.bf16.mxu1 %v4085_v23 }
 0x1ca   : > { %3164 = vmatmul.mubr.f32.gmra.mrb[2].mxu1 %v4113_v0 }
 0x1cb   : > { %3166 = vmatprep.mubr.f32.mxu1 %v4143_v32  ;;  %3359 = vmatpush3.bf16.msra.mxu1 %v4085_v23 }
 0x1cc   : > { %3361 = vmatprep.subr.bf16.mxu1 %v4036_v25 }
 0x1ce   : > { %3167 = vmatmul.mubr.f32.gmra.mrb[4].mxu1 %v4137_v20 }
 0x1cf   : > { %3169 = vmatprep.mubr.f32.mxu1 %v4167_v33 }
 0x1d2   : > { %3170 = vmatmul.mubr.f32.gmra.mrb[6].mxu1 %v4161_v22 }
 0x1d3   : > { %3172 = vmatprep.mubr.f32.mxu1 %v4193_v48 }
 0x1d6   : > { %3173 = vmatmul.mubr.f32.gmra.mrb[8].mxu1 %v4187_v24 }
 0x1d7   : > { %3175 = vmatprep.mubr.f32.mxu1 %v4219_v63 }
 0x1da   : > { %3176 = vmatmul.mubr.f32.gmra.mrb[10].mxu1 %v4213_v29 }
 0x1db   : > { %3178 = vmatprep.mubr.f32.mxu1 %v4243_v56 }
 0x1de   : > { %3179 = vmatmul.mubr.f32.gmra.mrb[12].mxu1 %v4237_v1 }
 0x1df   : > { %3181 = vmatprep.mubr.f32.mxu1 %v4267_v46 }
 0x1e2   : > { %3182 = vmatmul.mubr.f32.gmra.mrb[14].mxu1 %v4261_v45 }
 0x1e3   : > { %3192 = vmatprep.mubr.f32.mxu1 %v4108_v57 }
 0x1e6   : > { %3193 = vmatmul.mubr.f32.vlgmr.msra.gmra.mrb[0].mxu1 %v4105_v52 }
 0x1e7   : > { %3363 = vmatpush3.bf16.msra.mxu1 %v4036_v25  ;;  %3195 = vmatprep.mubr.f32.mxu1 %v4129_v15 }
 0x1e8   : > { %3365 = vmatprep.subr.bf16.mxu1 %v4046_v36 }
 0x1ea   : > { %3196 = vmatmul.mubr.f32.gmra.mrb[2].mxu1 %v4123_v9 }
 0x1eb   : > { %3198 = vmatprep.mubr.f32.mxu1 %v4153_v7  ;;  %3367 = vmatpush3.bf16.msra.mxu1 %v4046_v36 }
 0x1ec   : > { %3369 = vmatprep.subr.bf16.mxu1 %v3368_v17 }
 0x1ee   : > { %3199 = vmatmul.mubr.f32.gmra.mrb[4].mxu1 %v4147_v59 }
 0x1ef   : > { %3201 = vmatprep.mubr.f32.mxu1 %v4179_v61 }
 0x1f2   : > { %3202 = vmatmul.mubr.f32.gmra.mrb[6].mxu1 %v4172_v43 }
 0x1f3   : > { %3204 = vmatprep.mubr.f32.mxu1 %v4205_v16 }
 0x1f6   : > { %3205 = vmatmul.mubr.f32.gmra.mrb[8].mxu1 %v4198_v60 }
 0x1f7   : > { %3207 = vmatprep.mubr.f32.mxu1 %v4229_v44 }
 0x1fa   : > { %3208 = vmatmul.mubr.f32.gmra.mrb[10].mxu1 %v4223_v14 }
 0x1fb   : > { %3210 = vmatprep.mubr.f32.mxu1 %v4253_v35 }
 0x1fe   : > { %3211 = vmatmul.mubr.f32.gmra.mrb[12].mxu1 %v4247_v13 }
 0x1ff   : > { %3213 = vmatprep.mubr.f32.mxu1 %v4277_v62 }
 0x202   : > { %3214 = vmatmul.mubr.f32.gmra.mrb[14].mxu1 %v4271_v3 }
 0x203   : > { %3224 = vmatprep.mubr.f32.mxu1 %v1524_v8 }
 0x206   : > { %3225 = vmatmul.mubr.f32.vlgmr.msra.gmra.mrb[0].mxu1 %v1534_v5 }
 0x207   : > { %3371 = vmatpush3.bf16.msra.mxu1 %v3368_v17  ;;  %3227 = vmatprep.mubr.f32.mxu1 %v1544_v39 }
 0x208   : > { %3373 = vmatprep.subr.bf16.mxu1 %v3372_v37 }
 0x20a   : > { %3228 = vmatmul.mubr.f32.gmra.mrb[2].mxu1 %v1554_v30 }
 0x20b   : > { %3230 = vmatprep.mubr.f32.mxu1 %v1564_v42  ;;  %3375 = vmatpush3.bf16.msra.mxu1 %v3372_v37 }
 0x20c   : > { %3377 = vmatprep.subr.bf16.mxu1 %v4036_v25 }
 0x20e   : > { %3231 = vmatmul.mubr.f32.gmra.mrb[4].mxu1 %v1574_v31 }
 0x20f   : > { %3233 = vmatprep.mubr.f32.mxu1 %v1584_v58 }
 0x212   : > { %3234 = vmatmul.mubr.f32.gmra.mrb[6].mxu1 %v1594_v28 }
 0x213   : > { %3236 = vmatprep.mubr.f32.mxu1 %v4490_v38 }
 0x216   : > { %3237 = vmatmul.mubr.f32.gmra.mrb[8].mxu1 %v4491_v40 }
 0x217   : > { %3239 = vmatprep.mubr.f32.mxu1 %v4492_v41 }
 0x21a   : > { %3240 = vmatmul.mubr.f32.gmra.mrb[10].mxu1 %v4493_v50 }
 0x21b   : > { %3242 = vmatprep.mubr.f32.mxu1 %v1644_v18 }
 0x21e   : > { %3243 = vmatmul.mubr.f32.gmra.mrb[12].mxu1 %v4494_v51 }
 0x21f   : > { %3245 = vmatprep.mubr.f32.mxu1 %v1664_v27 }
 0x222   : > { %3246 = vmatmul.mubr.f32.gmra.mrb[14].mxu1 %v1674_v21 }
 0x223   : > { %3256 = vmatprep.mubr.f32.mxu1 %v4102_v49 }
 0x226   : > { %3257 = vmatmul.mubr.f32.vlgmr.msra.gmra.mrb[0].mxu1 %v4097_v47 }
 0x227   : > { %3379 = vmatpush3.bf16.msra.mxu1 %v4036_v25  ;;  %3259 = vmatprep.mubr.f32.mxu1 %v4119_v6 }
 0x228   : > { %3381 = vmatprep.subr.bf16.mxu1 %v4046_v36 }
 0x22a   : > { %3260 = vmatmul.mubr.f32.gmra.mrb[2].mxu1 %v4113_v0 }
 0x22b   : > { %3262 = vmatprep.mubr.f32.mxu1 %v4143_v32  ;;  %3383 = vmatpush3.bf16.msra.mxu1 %v4046_v36 }
 0x22e   : > { %3263 = vmatmul.mubr.f32.gmra.mrb[4].mxu1 %v4137_v20 }
 0x22f   : > { %3265 = vmatprep.mubr.f32.mxu1 %v4167_v33 }
 0x232   : > { %3266 = vmatmul.mubr.f32.gmra.mrb[6].mxu1 %v4161_v22 }
 0x233   : > { %3268 = vmatprep.mubr.f32.mxu1 %v4193_v48 }
 0x236   : > { %3269 = vmatmul.mubr.f32.gmra.mrb[8].mxu1 %v4187_v24 }
 0x237   : > { %3271 = vmatprep.mubr.f32.mxu1 %v4219_v63 }
 0x23a   : > { %3272 = vmatmul.mubr.f32.gmra.mrb[10].mxu1 %v4213_v29 }
 0x23b   : > { %3274 = vmatprep.mubr.f32.mxu1 %v4243_v56 }
 0x23e   : > { %3275 = vmatmul.mubr.f32.gmra.mrb[12].mxu1 %v4237_v1 }
 0x23f   : > { %3277 = vmatprep.mubr.f32.mxu1 %v4267_v46 }
 0x242   : > { %3278 = vmatmul.mubr.f32.gmra.mrb[14].mxu1 %v4261_v45 }
 0x243   : > { %3288 = vmatprep.mubr.f32.mxu1 %v4102_v49 }
 0x246   : > { %3289 = vmatmul.mubr.f32.vlgmr.msra.gmra.mrb[0].mxu1 %v4097_v47 }
 0x247   : > { %3291 = vmatprep.mubr.f32.mxu1 %v4119_v6 }
 0x24a   : > { %3292 = vmatmul.mubr.f32.gmra.mrb[2].mxu1 %v4113_v0 }
 0x24b   : > { %3294 = vmatprep.mubr.f32.mxu1 %v4143_v32 }
 0x24e   : > { %3295 = vmatmul.mubr.f32.gmra.mrb[4].mxu1 %v4137_v20 }
 0x24f   : > { %3297 = vmatprep.mubr.f32.mxu1 %v4167_v33 }
 0x252   : > { %3298 = vmatmul.mubr.f32.gmra.mrb[6].mxu1 %v4161_v22 }
 0x253   : > { %3300 = vmatprep.mubr.f32.mxu1 %v4193_v48 }
 0x256   : > { %3301 = vmatmul.mubr.f32.gmra.mrb[8].mxu1 %v4187_v24 }
 0x257   : > { %3303 = vmatprep.mubr.f32.mxu1 %v4219_v63 }
 0x25a   : > { %3304 = vmatmul.mubr.f32.gmra.mrb[10].mxu1 %v4213_v29 }
 0x25b   : > { %3306 = vmatprep.mubr.f32.mxu1 %v4243_v56 }
 0x25e   : > { %3307 = vmatmul.mubr.f32.gmra.mrb[12].mxu1 %v4237_v1 }
 0x25f   : > { %3309 = vmatprep.mubr.f32.mxu1 %v4267_v46 }
 0x262   : > { %3310 = vmatmul.mubr.f32.gmra.mrb[14].mxu1 %v4261_v45 }
 0x319   : > { %v3290_v25 = vpop.f32.mrb[0].mxu1 }
 0x31a   : > { %2584 = vst [vmem:[%s4408_s6 + $0x8] sm:$0xff] %v3290_v25  ;;  %v2489_v36 = vpop.f32.mrb[1].mxu1 }
 0x31b   : > { %2583 = vst [vmem:[%s4408_s6] sm:$0xff] %v2489_v36 }
 0x31d   : > { %v3293_v53 = vpop.f32.mrb[2].mxu1 }
 0x31e   : > { %2586 = vst [vmem:[%s4408_s6 + $0x18] sm:$0xff] %v3293_v53  ;;  %v2501_v54 = vpop.f32.mrb[3].mxu1 }
 0x31f   : > { %2585 = vst [vmem:[%s4408_s6 + $0x10] sm:$0xff] %v2501_v54 }
 0x321   : > { %v3296_v23 = vpop.f32.mrb[4].mxu1 }
 0x322   : > { %2588 = vst [vmem:[%s4408_s6 + $0x28] sm:$0xff] %v3296_v23  ;;  %v2513_v47 = vpop.f32.mrb[5].mxu1 }
 0x323   : > { %2587 = vst [vmem:[%s4408_s6 + $0x20] sm:$0xff] %v2513_v47 }
 0x325   : > { %v3299_v49 = vpop.f32.mrb[6].mxu1 }
 0x326   : > { %2590 = vst [vmem:[%s4408_s6 + $0x38] sm:$0xff] %v3299_v49  ;;  %v2525_v52 = vpop.f32.mrb[7].mxu1 }
 0x327   : > { %2589 = vst [vmem:[%s4408_s6 + $0x30] sm:$0xff] %v2525_v52 }
 0x329   : > { %v3302_v57 = vpop.f32.mrb[8].mxu1 }
 0x32a   : > { %2592 = vst [vmem:[%s4408_s6 + $0x48] sm:$0xff] %v3302_v57  ;;  %v2537_v0 = vpop.f32.mrb[9].mxu1 }
 0x32b   : > { %2591 = vst [vmem:[%s4408_s6 + $0x40] sm:$0xff] %v2537_v0 }
 0x32d   : > { %v3305_v5 = vpop.f32.mrb[10].mxu1 }
 0x32e   : > { %2594 = vst [vmem:[%s4408_s6 + $0x58] sm:$0xff] %v3305_v5  ;;  %v2549_v6 = vpop.f32.mrb[11].mxu1 }
 0x32f   : > { %2593 = vst [vmem:[%s4408_s6 + $0x50] sm:$0xff] %v2549_v6 }
 0x331   : > { %v3308_v8 = vpop.f32.mrb[12].mxu1 }
 0x332   : > { %2596 = vst [vmem:[%s4408_s6 + $0x68] sm:$0xff] %v3308_v8  ;;  %v2561_v9 = vpop.f32.mrb[13].mxu1 }
 0x333   : > { %2595 = vst [vmem:[%s4408_s6 + $0x60] sm:$0xff] %v2561_v9 }
 0x335   : > { %v3311_v15 = vpop.f32.mrb[14].mxu1 }
 0x336   : > { %2598 = vst [vmem:[%s4408_s6 + $0x78] sm:$0xff] %v3311_v15  ;;  %v2573_v20 = vpop.f32.mrb[15].mxu1 }
 0x337   : > { %2597 = vst [vmem:[%s4408_s6 + $0x70] sm:$0xff] %v2573_v20 }
 0x338   : > { %3598 = shalt.err (!%p3595_p3)
}
 0x339   : > { %s3599_s22 = scalar_lea.hbm %s4429_s11, 2048  ;;  %s3603_s28 = scalar_lea.hbm %s4482_s4, 4096 }
 0x33a   : > { %p3600_p4 = scmp.ne.s32.totalorder %s4429_s11, %s3599_s22  ;;  %p3604_p9 = scmp.lt.u32.totalorder %s4429_s11, %s4482_s4 }
 0x33b   : > { %p3605_p10 = scmp.lt.u32.totalorder %s3603_s28, %s3599_s22  ;;  %p3607_p12 = scmp.lt.u32.totalorder %s3599_s22, %s4429_s11 }
 0x33c   : > { %p3601_p7 = pnand %p3600_p4, %p3715_p5 }
 0x33d   : > { %p3606_p11 = por %p3605_p10, %p3604_p9 }
 0x33e   : > { %p3602_p8 = pneg %p3601_p7 }
 0x33f   : > { %p3608_p13 = por %p3607_p12, %p3606_p11 }
 0x341   : > { %p3609_p0 = pnand %p3608_p13, %p3602_p8 }
 0x343   : > { %3612 = shalt.err (!%p3609_p0)
}
 0x344   : > { %s3650_s5 = smov 128   ;;  %s3651_s6 = smov 8  }
 0x345   : > { %3544 = dma.vmem_to_hbm [thread:$0]  (%p3715_p5), %s4431_s8, 2048, %s4429_s11, %s4437_s19, %s3650_s5, %s3650_s5, %s3651_s6  }
 0x346 PF: > { %p3550_p1 = scmp.ge.s32.totalorder %s3647_s18, 2  ;;  %s2645_s7 = sand.u32 1, %s3635_s15  }
 0x347   : > { %s2646_s9 = scalar_lea.sflag [#allocation3], %s2645_s7 }
 0x348   : > { %p3547_p2 = pnand %p3550_p1, %p3719_p6 }
 0x34a   : > { %3630 = dma.done.wait (!%p3547_p2), %s2646_s9, 2048  }
 0x34b   : > { %3632 = vsyncadd (!%p3547_p2), %s2646_s9, 4294965248  ;;  %p15_p3 = scmp.ge.s32.totalorder %s3702_s21, 4   ;;  %s4495_s15 = smov %s3639_s16 }
 0x34c   : > { %s4496_s16 = smov %s3643_s17  ;;  %s4497_s17 = smov %s3713_s24 }
 0x34d   : > { %s4498_s18 = smov %s3702_s21  ;;  %17 = sbr.rel (!%p15_p3) target bundleno = 3 (0x3), region = 79 }
 0x354   :  { %2651 = vsyncpa [#allocation3], 1 }
 0x355   :  { %2653 = vsyncpa [#allocation3 + $0x1], 1 }

</bundles_post_ra>
